<compile_context>
chip_gen: v6e
topology: v6e:2x2x1
jax: 0.10.0
libtpu: 0.0.40
codegen_flags: <defaults>
</compile_context>

<pallas_src>
import functools

import jax
import jax.numpy as jnp
import numpy as np
from jax.experimental import pallas as pl
from jax.experimental.pallas import tpu as pltpu


def _round_up(v, m):
    return ((v + m - 1) // m) * m


# -----------------------------------------------------------------------------
# Kernel 1: z0 = x @ W1  (bias added later, after propagation).
# Emits an f32 copy (for the temp[0]*z0 hidden term) and a bf16 copy (hop-0
# matmul operand).
# -----------------------------------------------------------------------------
def _lin1_kernel(x_ref, w1_ref, zf_ref, zb_ref, acc_ref, *, n_f):
    f = pl.program_id(1)

    @pl.when(f == 0)
    def _():
        acc_ref[...] = jnp.zeros_like(acc_ref)

    acc_ref[...] += jnp.dot(x_ref[...], w1_ref[...],
                            preferred_element_type=jnp.float32)

    @pl.when(f == n_f - 1)
    def _():
        zf_ref[...] = acc_ref[...]
        zb_ref[...] = acc_ref[...].astype(jnp.bfloat16)


# -----------------------------------------------------------------------------
# Kernel 2: GPR propagation (K hops, adjacency streamed as bf16 tiles) fused
# with bias + ReLU + lin2 + log_softmax head.
# grid = (K, n_row_blocks, n_col_blocks); all axes sequential because hop k+1
# depends on every row block of hop k.
# -----------------------------------------------------------------------------
def _prop_head_kernel(temp_ref,                   # SMEM (K+1,) f32 (prefetch)
                      adj_ref,                    # (bN, bN) bf16 tile of A_hat
                      z0r_ref,                    # (bN, Hp) f32   row block of z0
                      z0c_ref,                    # (bN, Hp) bf16  col block of z0
                      b1_ref, w2_ref, b2_ref,     # (1,Hp) (Hp,Cp) (1,Cp) f32
                      out_ref,                    # (bN, Cp) f32
                      xbuf, acc, hid,             # VMEM scratch
                      *, K, n_j, block_n, n_pad):
    k = pl.program_id(0)
    i = pl.program_id(1)
    j = pl.program_id(2)

    row = pl.ds(pl.multiple_of(i * block_n, block_n), block_n)

    # Per-(k, i) accumulator over adjacency column blocks.
    @pl.when(j == 0)
    def _():
        acc[...] = jnp.zeros_like(acc)

    # hidden <- temp[0] * z0 at the start of the first hop.
    @pl.when(jnp.logical_and(k == 0, j == 0))
    def _():
        hid[row, :] = temp_ref[0] * z0r_ref[...]

    # acc += A[i, j] @ x_k[j]   (x_0 from the z0 input, later hops from scratch)
    @pl.when(k == 0)
    def _():
        acc[...] += jnp.dot(adj_ref[...], z0c_ref[...],
                            preferred_element_type=jnp.float32)

    @pl.when(k > 0)
    def _():
        off = pl.multiple_of(((k + 1) % 2) * n_pad + j * block_n, block_n)
        x_prev = xbuf[pl.ds(off, block_n), :]
        acc[...] += jnp.dot(adj_ref[...], x_prev,
                            preferred_element_type=jnp.float32)

    # Column reduction done: fold into hidden, stash x_{k+1} (bf16) for next hop.
    @pl.when(j == n_j - 1)
    def _():
        x_new = acc[...]
        hid[row, :] += temp_ref[k + 1] * x_new
        off = pl.multiple_of((k % 2) * n_pad + i * block_n, block_n)
        xbuf[pl.ds(off, block_n), :] = x_new.astype(jnp.bfloat16)

    # Last hop: bias + ReLU + lin2 + log_softmax for this row block.
    @pl.when(jnp.logical_and(k == K - 1, j == n_j - 1))
    def _():
        # TODO(synk): dprate/dropout are identity here (inference semantics).
        h = jnp.maximum(hid[row, :] + b1_ref[...], 0.0)
        logits = jnp.dot(h, w2_ref[...],
                         preferred_element_type=jnp.float32) + b2_ref[...]
        m = jnp.max(logits, axis=1, keepdims=True)
        s = logits - m
        out_ref[...] = s - jnp.log(jnp.sum(jnp.exp(s), axis=1, keepdims=True))


def gprgnn_pre_forward(x, adj, temp, w1_t, b1, w2_t, b2, *, block_n=None):
    """x: (N, F), adj: (N, N) gcn-normalized, temp: (K+1,), w1_t: (F, H),
    b1: (H,), w2_t: (H, C), b2: (C,).  Returns log-probabilities (N, C)."""
    N, F = x.shape
    H = w1_t.shape[1]
    C = w2_t.shape[1]
    K = int(temp.shape[0]) - 1
    assert K >= 1, "GPR propagation needs K >= 1"

    # Lane-dense padding of the small dims.
    Fp = _round_up(F, 128)
    Hp = _round_up(H, 128)
    Cp = _round_up(C, 128)

    # Square adjacency tiles; the lane (column) tile edge must be a multiple of
    # 128.  Default 512 (sized for v5e/v6e 128 MiB VMEM); pass a smaller
    # block_n for v7x's 64 MiB budget or for small graphs.
    bN = _round_up(max(block_n if block_n is not None else 512, 128), 128)
    bN = min(bN, _round_up(N, 128))
    N_pad = _round_up(N, bN)
    nI = N_pad // bN
    bF = Fp if Fp <= 512 else (512 if Fp % 512 == 0 else 128)
    nF = Fp // bF

    f32 = jnp.float32
    # Zero padding does not perturb any matmul / relu result.
    x_p = jnp.zeros((N_pad, Fp), f32).at[:N, :F].set(x.astype(f32))
    adj_p = jnp.zeros((N_pad, N_pad), f32).at[:N, :N].set(adj.astype(f32))
    adj_b = adj_p.astype(jnp.bfloat16)
    w1_p = jnp.zeros((Fp, Hp), f32).at[:F, :H].set(w1_t.astype(f32))
    b1_p = jnp.zeros((1, Hp), f32).at[0, :H].set(b1.astype(f32))
    w2_p = jnp.zeros((Hp, Cp), f32).at[:H, :C].set(w2_t.astype(f32))
    # Padded classes get a -1e30 bias so they vanish from the softmax normalizer.
    b2_p = jnp.full((1, Cp), -1e30, f32).at[0, :C].set(b2.astype(f32))
    temp_p = temp.astype(f32)

    # Scoped-VMEM budget: resident scratch + double-buffered blocks, with margin.
    est = (2 * N_pad * Hp * 2          # x_k ping-pong (bf16)
           + N_pad * Hp * 4            # hidden (f32)
           + bN * Hp * 4               # per-(k,i) accumulator
           + 2 * (bN * bN * 2 + bN * Hp * 4 + bN * Hp * 2 + bN * Cp * 4)
           + Hp * Cp * 4 + 8 * (Hp + Cp))
    vmem_limit = int(min(100 * 2**20, max(32 * 2**20, 2 * est)))

    # --- call 1: z0 = x @ W1 ; row axis megacore-parallel -------------------
    z0_f32, z0_b16 = pl.pallas_call(
        functools.partial(_lin1_kernel, n_f=nF),
        out_shape=(jax.ShapeDtypeStruct((N_pad, Hp), jnp.float32),
                   jax.ShapeDtypeStruct((N_pad, Hp), jnp.bfloat16)),
        grid_spec=pltpu.PrefetchScalarGridSpec(
            num_scalar_prefetch=0,
            grid=(nI, nF),
            in_specs=[pl.BlockSpec((bN, bF), lambda i, f: (i, f)),
                      pl.BlockSpec((bF, Hp), lambda i, f: (f, 0))],
            out_specs=(pl.BlockSpec((bN, Hp), lambda i, f: (i, 0)),
                       pl.BlockSpec((bN, Hp), lambda i, f: (i, 0))),
            scratch_shapes=[pltpu.VMEM((bN, Hp), jnp.float32)]),
        compiler_params=pltpu.CompilerParams(
            dimension_semantics=("parallel", "arbitrary"),
            vmem_limit_bytes=vmem_limit),
    )(x_p, w1_p)

    # --- call 2: GPR propagation + head -------------------------------------
    kernel = functools.partial(_prop_head_kernel, K=K, n_j=nI,
                               block_n=bN, n_pad=N_pad)
    out_pad = pl.pallas_call(
        kernel,
        out_shape=jax.ShapeDtypeStruct((N_pad, Cp), jnp.float32),
        grid_spec=pltpu.PrefetchScalarGridSpec(
            num_scalar_prefetch=1,                      # temp -> SMEM (1-D)
            grid=(K, nI, nI),
            in_specs=[
                pl.BlockSpec((bN, bN), lambda k, i, j, t: (i, j)),   # adj bf16
                pl.BlockSpec((bN, Hp), lambda k, i, j, t: (i, 0)),   # z0 rows f32
                pl.BlockSpec((bN, Hp), lambda k, i, j, t: (j, 0)),   # z0 cols bf16
                pl.BlockSpec((1, Hp),  lambda k, i, j, t: (0, 0)),   # b1
                pl.BlockSpec((Hp, Cp), lambda k, i, j, t: (0, 0)),   # w2
                pl.BlockSpec((1, Cp),  lambda k, i, j, t: (0, 0)),   # b2
            ],
            out_specs=pl.BlockSpec((bN, Cp), lambda k, i, j, t: (i, 0)),
            scratch_shapes=[
                pltpu.VMEM((2 * N_pad, Hp), jnp.bfloat16),   # x_k ping-pong
                pltpu.VMEM((bN, Hp), jnp.float32),           # column accumulator
                pltpu.VMEM((N_pad, Hp), jnp.float32),        # GPR hidden
            ]),
        compiler_params=pltpu.CompilerParams(
            # hop k+1 needs every row block of hop k -> fully sequential grid.
            dimension_semantics=("arbitrary", "arbitrary", "arbitrary"),
            vmem_limit_bytes=vmem_limit),
    )(temp_p, adj_b, z0_f32, z0_b16, b1_p, w2_p, b2_p)

    return out_pad[:N, :C]


def build_normalized_adj(edge_index, num_nodes):
    """Dense gcn_norm: A_hat = D^{-1/2}(A + I)D^{-1/2}; duplicate edges sum."""
    src, dst = edge_index
    A = jnp.zeros((num_nodes, num_nodes), jnp.float32)
    A = A.at[dst, src].add(1.0)
    A = A + jnp.eye(num_nodes, dtype=jnp.float32)
    deg = A.sum(axis=1)
    dinv = jnp.where(deg > 0, 1.0 / jnp.sqrt(deg), 0.0)
    return dinv[:, None] * A * dinv[None, :]


def reference_forward(x, adj, temp, w1_t, b1, w2_t, b2):
    """Pure f32 reference following the original module order."""
    hidden = temp[0] * x
    xk = x
    for k in range(1, temp.shape[0]):
        xk = adj @ xk
        hidden = hidden + temp[k] * xk
    h = jnp.maximum(hidden @ w1_t + b1, 0.0)
    logits = h @ w2_t + b2
    return jax.nn.log_softmax(logits, axis=1)


if __name__ == "__main__":
    # Small problem sizes consistent with the module's forward; N chosen so the
    # tiled path (multiple 128x128 adjacency blocks + row padding) is exercised.
    N = 300         # number of nodes
    F_IN = 16       # dataset.num_features
    HIDDEN = 32     # args.hidden
    C = 8           # dataset.num_classes
    K = 4           # args.K
    ALPHA = 0.1     # args.alpha, Init = 'PPR'
    E = 600         # directed random edges before symmetrization

    key = jax.random.PRNGKey(0)
    kx, ke1, ke2, kw1, kb1, kw2, kb2 = jax.random.split(key, 7)

    x = jax.random.normal(kx, (N, F_IN), jnp.float32)

    src = jax.random.randint(ke1, (E,), 0, N)
    dst = jax.random.randint(ke2, (E,), 0, N)
    edge_index = jnp.stack(
        [jnp.concatenate([src, dst]), jnp.concatenate([dst, src])], axis=0)
    adj = build_normalized_adj(edge_index, N)

    # GPRPRE_prop temp parameter, Init == 'PPR'.
    temp_np = ALPHA * (1.0 - ALPHA) ** np.arange(K + 1)
    temp_np[-1] = (1.0 - ALPHA) ** K
    temp = jnp.asarray(temp_np, jnp.float32)

    # Linear layer parameters (torch Linear), stored pre-transposed to (in, out).
    lim1 = 1.0 / np.sqrt(F_IN)
    w1_t = jax.random.uniform(kw1, (F_IN, HIDDEN), jnp.float32, -lim1, lim1)
    b1 = jax.random.uniform(kb1, (HIDDEN,), jnp.float32, -lim1, lim1)
    lim2 = 1.0 / np.sqrt(HIDDEN)
    w2_t = jax.random.uniform(kw2, (HIDDEN, C), jnp.float32, -lim2, lim2)
    b2 = jax.random.uniform(kb2, (C,), jnp.float32, -lim2, lim2)

    out = gprgnn_pre_forward(x, adj, temp, w1_t, b1, w2_t, b2, block_n=128)
    out = jax.block_until_ready(out)

    ref = reference_forward(x, adj, temp, w1_t, b1, w2_t, b2)
    assert out.shape == (N, C)
    # bf16 adjacency / hop operands (f32 accumulation) -> loose-but-meaningful
    # tolerance vs. the pure-f32 reference.
    np.testing.assert_allclose(np.asarray(out), np.asarray(ref),
                               rtol=2e-2, atol=2e-2)

    print("KERNEL_OK")
</pallas_src>

<mosaic_0001>
module attributes {stable_mosaic.version = 11 : i64} {
  func.func @_lin1_kernel(%arg0: i32, %arg1: i32, %arg2: memref<128x128xf32, #tpu.memory_space<vmem>>, %arg3: memref<128x128xf32, #tpu.memory_space<vmem>>, %arg4: memref<128x128xf32, #tpu.memory_space<vmem>>, %arg5: memref<128x128xbf16, #tpu.memory_space<vmem>>, %arg6: memref<128x128xf32, #tpu.memory_space<vmem>>) attributes {dimension_semantics = [#tpu.dimension_semantics<parallel>, #tpu.dimension_semantics<arbitrary>], iteration_bounds = array<i64: 3, 1>, scalar_prefetch = 0 : i64, scratch_operands = 1 : i64, tpu.core_type = #tpu.core_type<tc>, window_params = [{transform_indices = @transform_0, window_bounds = array<i64: 128, 128>}, {transform_indices = @transform_1, window_bounds = array<i64: 128, 128>}, {transform_indices = @transform_2, window_bounds = array<i64: 128, 128>}, {transform_indices = @transform_3, window_bounds = array<i64: 128, 128>}]} {
    %c0_i32 = arith.constant 0 : i32
    %0 = arith.cmpi eq, %arg1, %c0_i32 : i32
    %1 = arith.extui %0 : i1 to i32
    %c0_i32_0 = arith.constant 0 : i32
    %2 = arith.cmpi ne, %1, %c0_i32_0 : i32
    scf.if %2 {
      %cst_10 = arith.constant 0.000000e+00 : f32
      %12 = vector.broadcast %cst_10 : f32 to vector<128x128xf32>
      %c0_11 = arith.constant 0 : index
      %c0_12 = arith.constant 0 : index
      %13 = vector.load %arg6[%c0_11, %c0_12] : memref<128x128xf32, #tpu.memory_space<vmem>>, vector<128x128xf32>
      tpu.vector_store %arg6[%c0_11, %c0_12], %12 {strides = array<i32>} : memref<128x128xf32, #tpu.memory_space<vmem>>, vector<128x128xf32>,
    } else {
    }
    %c0 = arith.constant 0 : index
    %c0_1 = arith.constant 0 : index
    %3 = vector.load %arg6[%c0, %c0_1] : memref<128x128xf32, #tpu.memory_space<vmem>>, vector<128x128xf32>
    %c0_2 = arith.constant 0 : index
    %c0_3 = arith.constant 0 : index
    %4 = vector.load %arg2[%c0_2, %c0_3] : memref<128x128xf32, #tpu.memory_space<vmem>>, vector<128x128xf32>
    %c0_4 = arith.constant 0 : index
    %c0_5 = arith.constant 0 : index
    %5 = vector.load %arg3[%c0_4, %c0_5] : memref<128x128xf32, #tpu.memory_space<vmem>>, vector<128x128xf32>
    %cst = arith.constant dense<0.000000e+00> : vector<128x128xf32>
    %6 = tpu.matmul %4, %5, %cst {dimension_numbers = #tpu.dot_dimension_numbers<[1], [0], [0], [1], [0, 0, 1, 1], [], []>} : vector<128x128xf32>, vector<128x128xf32>, vector<128x128xf32> -> vector<128x128xf32>
    %7 = arith.addf %3, %6 : vector<128x128xf32>
    %c0_6 = arith.constant 0 : index
    %c0_7 = arith.constant 0 : index
    %8 = vector.load %arg6[%c0_6, %c0_7] : memref<128x128xf32, #tpu.memory_space<vmem>>, vector<128x128xf32>
    tpu.vector_store %arg6[%c0_6, %c0_7], %7 {strides = array<i32>} : memref<128x128xf32, #tpu.memory_space<vmem>>, vector<128x128xf32>,
    %c0_i32_8 = arith.constant 0 : i32
    %9 = arith.cmpi eq, %arg1, %c0_i32_8 : i32
    %10 = arith.extui %9 : i1 to i32
    %c0_i32_9 = arith.constant 0 : i32
    %11 = arith.cmpi ne, %10, %c0_i32_9 : i32
    scf.if %11 {
      %c0_10 = arith.constant 0 : index
      %c0_11 = arith.constant 0 : index
      %12 = vector.load %arg6[%c0_10, %c0_11] : memref<128x128xf32, #tpu.memory_space<vmem>>, vector<128x128xf32>
      %c0_12 = arith.constant 0 : index
      %c0_13 = arith.constant 0 : index
      %13 = vector.load %arg4[%c0_12, %c0_13] : memref<128x128xf32, #tpu.memory_space<vmem>>, vector<128x128xf32>
      tpu.vector_store %arg4[%c0_12, %c0_13], %12 {strides = array<i32>} : memref<128x128xf32, #tpu.memory_space<vmem>>, vector<128x128xf32>,
      %c0_14 = arith.constant 0 : index
      %c0_15 = arith.constant 0 : index
      %14 = vector.load %arg6[%c0_14, %c0_15] : memref<128x128xf32, #tpu.memory_space<vmem>>, vector<128x128xf32>
      %15 = arith.truncf %14 : vector<128x128xf32> to vector<128x128xbf16>
      %c0_16 = arith.constant 0 : index
      %c0_17 = arith.constant 0 : index
      %16 = vector.load %arg5[%c0_16, %c0_17] : memref<128x128xbf16, #tpu.memory_space<vmem>>, vector<128x128xbf16>
      tpu.vector_store %arg5[%c0_16, %c0_17], %15 {strides = array<i32>} : memref<128x128xbf16, #tpu.memory_space<vmem>>, vector<128x128xbf16>,
    } else {
    }
    return
  }
  func.func @transform_0(%arg0: i32, %arg1: i32) -> (i32, i32) {
    %c0_i32 = arith.constant 0 : i32
    return %arg0, %arg1 : i32, i32
  }
  func.func @transform_1(%arg0: i32, %arg1: i32) -> (i32, i32) {
    %c0_i32 = arith.constant 0 : i32
    %c0_i32_0 = arith.constant 0 : i32
    return %arg1, %c0_i32 : i32, i32
  }
  func.func @transform_2(%arg0: i32, %arg1: i32) -> (i32, i32) {
    %c0_i32 = arith.constant 0 : i32
    %c0_i32_0 = arith.constant 0 : i32
    return %arg0, %c0_i32 : i32, i32
  }
  func.func @transform_3(%arg0: i32, %arg1: i32) -> (i32, i32) {
    %c0_i32 = arith.constant 0 : i32
    %c0_i32_0 = arith.constant 0 : i32
    return %arg0, %c0_i32 : i32, i32
  }
}

</mosaic_0001>

<bundles_post_ra>
// kernel: tpu_custom_call.1
= control target key start
LH: loop header
LB: loop body
LE: loop exit
PB: predicated region body
PF: predicated region fallthrough
CT: control target
= control target key end

     0   :  { %9 = vsyncpa [#allocation4], 0  ;;  %s1556_s0 = inlined_call_operand.hbm [shape: f32[384,128], index: 0, kind: input, shape index: {}]   ;;  %s1557_s1 = inlined_call_operand.hbm [shape: f32[128,128], index: 1, kind: input, shape index: {}]   ;;  %s1558_s2 = inlined_call_operand.hbm [shape: f32[384,128], index: 2, kind: output, shape index: {0}]   ;;  %s1559_s3 = inlined_call_operand.hbm [shape: bf16[384,128], index: 3, kind: output, shape index: {1}]  }
   0x1   :  { %11 = vsyncpa [#allocation4 + $0x1], 0 }
   0x2   :  { %12 = vsyncpa [#allocation7], 0 }
   0x3   :  { %13 = vsyncpa [#allocation5], 0 }
   0x4   :  { %15 = vsyncpa [#allocation5 + $0x1], 0 }
   0x5   :  { %16 = vsyncpa [#allocation10], 0 }
   0x6   :  { %18 = vsyncpa [#allocation10 + $0x1], 0  ;;  %s1287_s12 = smov 0   ;;  %s1289_s13 = smov 0  }
   0x7   :  { %s1291_s14 = smov 0   ;;  %s1293_s15 = smov 0  }
   0x8   :  { %s1295_s16 = smov 0   ;;  %s1297_s17 = smov 0  }
   0x9 LB: > { %s780_s18 = sadd.s32 4294967295, %s1255_s17   ;;  %s781_s19 = sadd.s32 4294967294, %s1255_s17   ;;  %s1255_s17 = sphi %s1297_s17, %s24_s17   ;;  %s1251_s16 = sphi %s1295_s16, %s1580_s16   ;;  %s1247_s15 = sphi %s1293_s15, %s1579_s15   ;;  %s1243_s14 = sphi %s1291_s14, %s1578_s14   ;;  %s1239_s13 = sphi %s1289_s13, %s1577_s13   ;;  %s1235_s12 = sphi %s1287_s12, %s1576_s12  }
   0xa   : > { %p58_p0 = scmp.ne.s32.totalorder %s1239_s13, %s1235_s12  ;;  %p1321_p1 = scmp.eq.s32.totalorder %s780_s18, 0 }
   0xb   : > { %p1325_p2 = scmp.eq.s32.totalorder %s780_s18, 2  ;;  %p114_p3 = scmp.eq.s32.totalorder %s781_s19, 2 }
   0xc   : > { %p1331_p4 = por %p1321_p1, %p58_p0  ;;  %p782_p5 = scmp.ge.s32.totalorder %s1255_s17, 1 }
   0xd   : > { %p1336_p6 = por %p114_p3, %p58_p0  ;;  %p147_p7 = scmp.lt.s32.totalorder %s1255_s17, 4 }
   0xe   : > { %s1257_s25 = smov [#allocation6]   ;;  %s36_s28 = sadd.s32 1, %s1251_s16 }
   0xf   : > { %s1566_s23 = scalar_select %p1336_p6, 1, 0 }
  0x10   : > { %p1341_p8 = pnand %p782_p5, %p147_p7  ;;  %s162_s26 = sshll.u32 %s1257_s25, 4  ;;  %s163_s26 = int_to_ptr.vmem [resolvable:$true] %s162_s26 }
  0x11   : > { %s1098_s29 = scalar_lea.vmem %s163_s26, 2048  ;;  %p1106_p3 = scmp.lt.s32.totalorder %s163_s26, %s163_s26 }
  0x12   : > { %p1013_p9 = pneg %p1341_p8  ;;  %p1099_p12 = scmp.ne.s32.totalorder %s163_s26, %s1098_s29 }
  0x13   : > { %p1107_p5 = scmp.lt.s32.totalorder %s1098_s29, %s1098_s29 }
  0x14   : > { %p1349_p10 = pnand %p1013_p9, %p1321_p1 }
  0x15   : > { %p1108_p7 = por %p1107_p5, %p1106_p3 }
  0x16   : > { %p1089_p11 = pneg %p1349_p10 }
  0x18   : > { %p1101_p13 = pnand %p1099_p12, %p1089_p11 }
  0x1a   : > { %p1102_p0 = pneg %p1101_p13 }
  0x1c   : > { %p1109_p6 = pnand %p1108_p7, %p1102_p0 }
  0x1e   : > { %1112 = shalt.err (!%p1109_p6)
}
  0x1f   : > { %s1560_s30 = smov 128   ;;  %s1561_s4 = smov 8  }
  0x20   : > { %1016 = dma.hbm_to_vmem [thread:$0]  (!%p1349_p10), %s1557_s1, 2048, %s163_s26, [#allocation7], %s1560_s30, %s1560_s30, %s1561_s4  }
  0x21   : > { %p38_p6 = scmp.ge.s32.totalorder %s36_s28, 3  ;;  %s45_s7 = sadd.s32 1, %s1243_s14 }
  0x22   : > { %p52_p9 = scmp.ne.s32.totalorder %s1243_s14, %s1239_s13  ;;  %p53_p11 = scmp.eq.s32.totalorder %s1255_s17, 0 }
  0x23   : > { %s1582_s28 = smov (%p38_p6, %s36_s28), 0  ;;  %p1029_p0 = scmp.lt.s32.totalorder %s1255_s17, 3 }
  0x24   : > { %p1370_p12 = por %p53_p11, %p52_p9  ;;  %p1376_p13 = por %p1325_p2, %p52_p9 }
  0x25   : > { %s40_s10 = ssub.s32 %s1251_s16, %s1582_s28  ;;  %s176_s11 = sand.u32 1, %s1243_s14  }
  0x26   : > { %s1570_s9 = scalar_select %p1376_p13, 1, 0 }
  0x27   : > { %p43_p10 = scmp.eq.s32.totalorder %s40_s10, 0  ;;  %s785_s18 = sshll.u32 %s176_s11, 7 }
  0x28   : > { %s817_s25 = sshll.u32 %s1251_s16, 11  ;;  %s180_s5 = scalar_lea.vmem [#allocation3], %s785_s18 }
  0x29   : > { %s1385_s19 = scalar_select %p43_p10, %s1243_s14, %s45_s7  }
  0x2a   : > { %s187_s29 = scalar_lea.hbm %s1556_s0, %s817_s25  ;;  %s188_s6 = sshll.u32 %s180_s5, 4  ;;  %s189_s6 = int_to_ptr.vmem [resolvable:$true] %s188_s6 }
  0x2b   : > { %p1393_p2 = pnand %p1029_p0, %p1370_p12  ;;  %s177_s30 = scalar_lea.sflag [#allocation4], %s176_s11 }
  0x2c   : > { %s1126_s10 = scalar_lea.vmem %s189_s6, 2048  ;;  %s1260_s7 = smov [#allocation3]  }
  0x2d   : > { %p1115_p3 = pneg %p1393_p2  ;;  %p1127_p5 = scmp.ne.s32.totalorder %s189_s6, %s1126_s10 }
  0x2e   : > { %s1131_s4 = sshll.u32 %s1260_s7, 4  ;;  %s1132_s4 = int_to_ptr.vmem [resolvable:$false] %s1131_s4 }
  0x2f   : > { %p1129_p7 = pnand %p1127_p5, %p1115_p3  ;;  %s1133_s25 = scalar_lea.vmem %s1132_s4, 4096 }
  0x30   : > { %p1134_p9 = scmp.lt.s32.totalorder %s189_s6, %s1132_s4  ;;  %p1135_p11 = scmp.lt.s32.totalorder %s1133_s25, %s1126_s10 }
  0x31   : > { %p1130_p6 = pneg %p1129_p7 }
  0x32   : > { %p1136_p10 = por %p1135_p11, %p1134_p9 }
  0x34   : > { %p1137_p13 = pnand %p1136_p10, %p1130_p6 }
  0x36   : > { %1140 = shalt.err (!%p1137_p13)
}
  0x37   : > { %s1572_s8 = smov 8   ;;  %s1573_s18 = smov 128  }
  0x38   : > { %1020 = dma.hbm_to_vmem [thread:$0]  (!%p1393_p2), %s187_s29, 2048, %s189_s6, %s177_s30, %s1573_s18, %s1573_s18, %s1572_s8  }
  0x39   : > { %200 = sbr.rel (%p1341_p8) target bundleno = 343 (0x157), region = 28  ;;  %s1407_s11 = sand.u32 (!%p1341_p8), 1, %s1239_s13  }
  0x3a   : > { %s789_s4 = sshll.u32 (!%p1341_p8), %s1407_s11, 7  ;;  %s203_s26 = scalar_lea.sflag (!%p1341_p8), [#allocation4], %s1407_s11 }
  0x3b   : > { %s1413_s27 = scalar_lea.vmem (!%p1341_p8), [#allocation3], %s789_s4 }
  0x3e   : > { %1218 = dma.done.wait (%p1331_p4), %s203_s26, 2048  }
  0x3f   : > { %1220 = vsyncadd (%p1331_p4), %s203_s26, 4294965248 }
  0x40   : > { %1222 = dma.done.wait (%p1321_p1), [#allocation7], 2048  }
  0x41   : > { %1224 = vsyncadd (%p1321_p1), [#allocation7], 4294965248  ;;  %v309_v0 = vld [vmem:[#allocation6 + $0x78] sm:$0xff]  ;;  %v308_v1 = vld [vmem:[#allocation6 + $0x70] sm:$0xff]  ;;  %s792_s20 = sshll.u32 %s1407_s11, 6  ;;  %s1442_s22 = scalar_lea.vmem [#allocation8], %s789_s4 }
  0x42   : > { %915 = vmatprep.subr.mxu0 %v309_v0  ;;  %971 = vmatprep.subr.mxu1 %v309_v0  ;;  %v307_v2 = vld [vmem:[#allocation6 + $0x68] sm:$0xff]  ;;  %v306_v3 = vld [vmem:[#allocation6 + $0x60] sm:$0xff]  ;;  %v305_v4 = vld [vmem:[#allocation6 + $0x58] sm:$0xff]  ;;  %s1448_s24 = scalar_lea.vmem [#allocation9], %s792_s20  ;;  %s834_s29 = sshll.u32 %s1247_s15, 11 }
  0x43   : > { %916 = vmatpush3.msra.mxu0 %v309_v0  ;;  %987 = vmatpush3.msra.mxu1 %v309_v0  ;;  %v304_v5 = vld [vmem:[#allocation6 + $0x50] sm:$0xff]  ;;  %v303_v6 = vld [vmem:[#allocation6 + $0x48] sm:$0xff]  ;;  %v302_v7 = vld [vmem:[#allocation6 + $0x40] sm:$0xff]  ;;  %s653_s30 = sshll.u32 %s1448_s24, 4  ;;  %s637_s5 = sshll.u32 %s1442_s22, 4  ;;  %s1463_s30 = int_to_ptr.vmem [resolvable:$true] %s653_s30  ;;  %s1472_s5 = int_to_ptr.vmem [resolvable:$true] %s637_s5 }
  0x44   : > { %917 = vmatprep.subr.mxu0 %v308_v1  ;;  %972 = vmatprep.subr.mxu1 %v308_v1  ;;  %v301_v8 = vld [vmem:[#allocation6 + $0x38] sm:$0xff]  ;;  %v300_v9 = vld [vmem:[#allocation6 + $0x30] sm:$0xff]  ;;  %v299_v10 = vld [vmem:[#allocation6 + $0x28] sm:$0xff]  ;;  %s1470_s10 = scalar_lea.hbm %s1558_s2, %s834_s29  ;;  %s835_s7 = sshll.u32 %s1247_s15, 10 }
  0x45   : > { %918 = vmatpush3.msra.mxu0 %v308_v1  ;;  %988 = vmatpush3.msra.mxu1 %v308_v1  ;;  %v298_v11 = vld [vmem:[#allocation6 + $0x20] sm:$0xff]  ;;  %v297_v12 = vld [vmem:[#allocation6 + $0x18] sm:$0xff]  ;;  %v296_v13 = vld [vmem:[#allocation6 + $0x10] sm:$0xff]  ;;  %s1484_s18 = scalar_lea.hbm %s1559_s3, %s835_s7  ;;  %s619_s4 = scalar_lea.sflag [#allocation5], %s1407_s11 }
  0x46   : > { %919 = vmatprep.subr.mxu0 %v307_v2  ;;  %973 = vmatprep.subr.mxu1 %v307_v2  ;;  %v295_v14 = vld [vmem:[#allocation6 + $0x8] sm:$0xff]  ;;  %v294_v15 = vld [vmem:[#allocation6] sm:$0xff]  ;;  %v280_v20 = vld [vmem:[%s1413_s27 + $0x10] sm:$0xff]  ;;  %s1141_s26 = scalar_lea.vmem %s1472_s5, 2048  ;;  %p1574_p4 = scmp.ne.s32.totalorder %s1570_s9, 0 }
  0x47   : > { %920 = vmatpush3.msra.mxu0 %v307_v2  ;;  %989 = vmatpush3.msra.mxu1 %v307_v2  ;;  %v278_v16 = vld [vmem:[%s1413_s27] sm:$0xff]  ;;  %v279_v18 = vld [vmem:[%s1413_s27 + $0x8] sm:$0xff]  ;;  %v288_v21 = vld [vmem:[%s1413_s27 + $0x50] sm:$0xff]  ;;  %p1142_p1 = scmp.ne.s32.totalorder %s1472_s5, %s1141_s26  ;;  %s1261_s15 = smov [#allocation8]  }
  0x48   : > { %921 = vmatprep.subr.mxu0 %v306_v3  ;;  %974 = vmatprep.subr.mxu1 %v306_v3  ;;  %v286_v17 = vld [vmem:[%s1413_s27 + $0x40] sm:$0xff]  ;;  %v287_v19 = vld [vmem:[%s1413_s27 + $0x48] sm:$0xff]  ;;  %v281_v22 = vld [vmem:[%s1413_s27 + $0x18] sm:$0xff] }
  0x49   : > { %922 = vmatpush3.msra.mxu0 %v306_v3  ;;  %990 = vmatpush3.msra.mxu1 %v306_v3  ;;  %v289_v23 = vld [vmem:[%s1413_s27 + $0x58] sm:$0xff]  ;;  %v282_v24 = vld [vmem:[%s1413_s27 + $0x20] sm:$0xff]  ;;  %v283_v26 = vld [vmem:[%s1413_s27 + $0x28] sm:$0xff]  ;;  %p1143_p8 = pnand %p1142_p1, %p1574_p4 }
  0x4a   : > { %923 = vmatprep.subr.mxu0 %v305_v4  ;;  %975 = vmatprep.subr.mxu1 %v305_v4  ;;  %v290_v25 = vld [vmem:[%s1413_s27 + $0x60] sm:$0xff]  ;;  %v291_v27 = vld [vmem:[%s1413_s27 + $0x68] sm:$0xff]  ;;  %v284_v28 = vld [vmem:[%s1413_s27 + $0x30] sm:$0xff] }
  0x4b   : > { %924 = vmatpush3.msra.mxu0 %v305_v4  ;;  %991 = vmatpush3.msra.mxu1 %v305_v4  ;;  %v292_v29 = vld [vmem:[%s1413_s27 + $0x70] sm:$0xff]  ;;  %v285_v30 = vld [vmem:[%s1413_s27 + $0x38] sm:$0xff]  ;;  %p1144_p12 = pneg %p1143_p8 }
  0x4c   : > { %925 = vmatprep.subr.mxu0 %v304_v5  ;;  %976 = vmatprep.subr.mxu1 %v304_v5  ;;  %v293_v31 = vld [vmem:[%s1413_s27 + $0x78] sm:$0xff]  ;;  %s1145_s27 = sshll.u32 %s1261_s15, 4  ;;  %s1146_s27 = int_to_ptr.vmem [resolvable:$false] %s1145_s27 }
  0x4d   : > { %926 = vmatpush3.msra.mxu0 %v304_v5  ;;  %992 = vmatpush3.msra.mxu1 %v304_v5  ;;  %s1147_s20 = scalar_lea.vmem %s1146_s27, 4096  ;;  %p1148_p13 = scmp.lt.s32.totalorder %s1472_s5, %s1146_s27 }
  0x4e   : > { %927 = vmatprep.subr.mxu0 %v303_v6  ;;  %977 = vmatprep.subr.mxu1 %v303_v6  ;;  %p1149_p0 = scmp.lt.s32.totalorder %s1147_s20, %s1141_s26 }
  0x4f   : > { %928 = vmatpush3.msra.mxu0 %v303_v6  ;;  %993 = vmatpush3.msra.mxu1 %v303_v6 }
  0x50   : > { %929 = vmatprep.subr.mxu0 %v302_v7  ;;  %978 = vmatprep.subr.mxu1 %v302_v7  ;;  %p1150_p2 = por %p1149_p0, %p1148_p13 }
  0x51   : > { %930 = vmatpush3.msra.mxu0 %v302_v7  ;;  %994 = vmatpush3.msra.mxu1 %v302_v7 }
  0x52   : > { %931 = vmatprep.subr.mxu0 %v301_v8  ;;  %979 = vmatprep.subr.mxu1 %v301_v8  ;;  %p1151_p3 = pnand %p1150_p2, %p1144_p12 }
  0x53   : > { %932 = vmatpush3.msra.mxu0 %v301_v8  ;;  %995 = vmatpush3.msra.mxu1 %v301_v8 }
  0x54   : > { %933 = vmatprep.subr.mxu0 %v300_v9  ;;  %980 = vmatprep.subr.mxu1 %v300_v9 }
  0x55   : > { %934 = vmatpush3.msra.mxu0 %v300_v9  ;;  %996 = vmatpush3.msra.mxu1 %v300_v9 }
  0x56   : > { %935 = vmatprep.subr.mxu0 %v299_v10  ;;  %981 = vmatprep.subr.mxu1 %v299_v10 }
  0x57   : > { %936 = vmatpush3.msra.mxu0 %v299_v10  ;;  %997 = vmatpush3.msra.mxu1 %v299_v10 }
  0x58   : > { %937 = vmatprep.subr.mxu0 %v298_v11  ;;  %982 = vmatprep.subr.mxu1 %v298_v11 }
  0x59   : > { %938 = vmatpush3.msra.mxu0 %v298_v11  ;;  %998 = vmatpush3.msra.mxu1 %v298_v11 }
  0x5a   : > { %939 = vmatprep.subr.mxu0 %v297_v12  ;;  %983 = vmatprep.subr.mxu1 %v297_v12 }
  0x5b   : > { %940 = vmatpush3.msra.mxu0 %v297_v12  ;;  %999 = vmatpush3.msra.mxu1 %v297_v12 }
  0x5c   : > { %941 = vmatprep.subr.mxu0 %v296_v13  ;;  %984 = vmatprep.subr.mxu1 %v296_v13 }
  0x5d   : > { %942 = vmatpush3.msra.mxu0 %v296_v13  ;;  %1000 = vmatpush3.msra.mxu1 %v296_v13 }
  0x5e   : > { %943 = vmatprep.subr.mxu0 %v295_v14  ;;  %985 = vmatprep.subr.mxu1 %v295_v14 }
  0x5f   : > { %944 = vmatpush3.msra.mxu0 %v295_v14  ;;  %1001 = vmatpush3.msra.mxu1 %v295_v14 }
  0x60   : > { %945 = vmatprep.subr.mxu0 %v294_v15  ;;  %986 = vmatprep.subr.mxu1 %v294_v15 }
  0x61   : > { %946 = vmatpush3.msra.mxu0 %v294_v15  ;;  %1002 = vmatpush3.msra.mxu1 %v294_v15 }
  0x62   : > { %947 = vmatprep.mubr.f32.mxu0 %v278_v16  ;;  %959 = vmatprep.mubr.f32.mxu1 %v286_v17 }
  0x63   : > { %948 = vmatmul.mubr.f32.vlgmr.msra.gmra.mxu0 %v279_v18  ;;  %960 = vmatmul.mubr.f32.vlgmr.msra.gmra.mxu1 %v287_v19 }
  0x64   : > { %950 = vmatprep.mubr.f32.mxu0 %v280_v20  ;;  %962 = vmatprep.mubr.f32.mxu1 %v288_v21 }
  0x67   : > { %951 = vmatmul.mubr.f32.gmra.mxu0 %v281_v22  ;;  %963 = vmatmul.mubr.f32.gmra.mxu1 %v289_v23 }
  0x68   : > { %953 = vmatprep.mubr.f32.mxu0 %v282_v24  ;;  %965 = vmatprep.mubr.f32.mxu1 %v290_v25 }
  0x6b   : > { %954 = vmatmul.mubr.f32.gmra.mxu0 %v283_v26  ;;  %966 = vmatmul.mubr.f32.gmra.mxu1 %v291_v27 }
  0x6c   : > { %956 = vmatprep.mubr.f32.mxu0 %v284_v28  ;;  %968 = vmatprep.mubr.f32.mxu1 %v292_v29 }
  0x6f   : > { %957 = vmatmul.mubr.f32.gmra.mxu0 %v285_v30  ;;  %969 = vmatmul.mubr.f32.gmra.mxu1 %v293_v31 }
 0x123   : > { %v949_v32 = vpop.f32.mrf.mxu0  ;;  %v961_v33 = vpop.f32.mrf.mxu1 }
 0x124   : > { %507 = vst [vmem:[%s1442_s22 + $0x8] sm:$0xff] %v949_v32  ;;  %515 = vst [vmem:[%s1442_s22 + $0x48] sm:$0xff] %v961_v33 }
 0x125   : > { %v376_v34 = vpop.f32.mrf.mxu0  ;;  %v416_v35 = vpop.f32.mrf.mxu1 }
 0x126   : > { %506 = vst [vmem:[%s1442_s22] sm:$0xff] %v376_v34  ;;  %v839_v36 = vpack.c.bf16 %v949_v32, %v376_v34  ;;  %514 = vst [vmem:[%s1442_s22 + $0x40] sm:$0xff] %v416_v35  ;;  %v859_v37 = vpack.c.bf16 %v961_v33, %v416_v35 }
 0x127   : > { %v952_v38 = vpop.f32.mrf.mxu0  ;;  %v964_v39 = vpop.f32.mrf.mxu1 }
 0x128   : > { %840 = vst [vmem:[%s1448_s24] sm:$0xff] %v839_v36   ;;  %879 = vst [vmem:[%s1448_s24 + $0x20] sm:$0xff] %v859_v37  }
 0x129   : > { %509 = vst [vmem:[%s1442_s22 + $0x18] sm:$0xff] %v952_v38  ;;  %517 = vst [vmem:[%s1442_s22 + $0x58] sm:$0xff] %v964_v39  ;;  %v386_v40 = vpop.f32.mrf.mxu0  ;;  %v426_v41 = vpop.f32.mrf.mxu1 }
 0x12a   : > { %508 = vst [vmem:[%s1442_s22 + $0x10] sm:$0xff] %v386_v40  ;;  %v844_v42 = vpack.c.bf16 %v952_v38, %v386_v40  ;;  %516 = vst [vmem:[%s1442_s22 + $0x50] sm:$0xff] %v426_v41  ;;  %v864_v43 = vpack.c.bf16 %v964_v39, %v426_v41 }
 0x12b   : > { %v955_v44 = vpop.f32.mrf.mxu0  ;;  %v967_v45 = vpop.f32.mrf.mxu1 }
 0x12c   : > { %876 = vst [vmem:[%s1448_s24 + $0x8] sm:$0xff] %v844_v42   ;;  %880 = vst [vmem:[%s1448_s24 + $0x28] sm:$0xff] %v864_v43  }
 0x12d   : > { %511 = vst [vmem:[%s1442_s22 + $0x28] sm:$0xff] %v955_v44  ;;  %519 = vst [vmem:[%s1442_s22 + $0x68] sm:$0xff] %v967_v45  ;;  %v396_v46 = vpop.f32.mrf.mxu0  ;;  %v436_v47 = vpop.f32.mrf.mxu1 }
 0x12e   : > { %510 = vst [vmem:[%s1442_s22 + $0x20] sm:$0xff] %v396_v46  ;;  %v849_v48 = vpack.c.bf16 %v955_v44, %v396_v46  ;;  %518 = vst [vmem:[%s1442_s22 + $0x60] sm:$0xff] %v436_v47  ;;  %v869_v49 = vpack.c.bf16 %v967_v45, %v436_v47 }
 0x12f   : > { %v958_v50 = vpop.f32.mrf.mxu0  ;;  %v970_v51 = vpop.f32.mrf.mxu1 }
 0x130   : > { %877 = vst [vmem:[%s1448_s24 + $0x10] sm:$0xff] %v849_v48   ;;  %881 = vst [vmem:[%s1448_s24 + $0x30] sm:$0xff] %v869_v49  }
 0x131   : > { %513 = vst [vmem:[%s1442_s22 + $0x38] sm:$0xff] %v958_v50  ;;  %521 = vst [vmem:[%s1442_s22 + $0x78] sm:$0xff] %v970_v51  ;;  %v406_v52 = vpop.f32.mrf.mxu0  ;;  %v446_v53 = vpop.f32.mrf.mxu1 }
 0x132   : > { %512 = vst [vmem:[%s1442_s22 + $0x30] sm:$0xff] %v406_v52  ;;  %v854_v54 = vpack.c.bf16 %v958_v50, %v406_v52  ;;  %520 = vst [vmem:[%s1442_s22 + $0x70] sm:$0xff] %v446_v53  ;;  %v874_v55 = vpack.c.bf16 %v970_v51, %v446_v53 }
 0x133   : > { %1154 = shalt.err (!%p1151_p3)
}
 0x134   : > { %s1155_s22 = scalar_lea.hbm %s1470_s10, 2048  ;;  %s1159_s21 = scalar_lea.hbm %s1558_s2, 6144 }
 0x135   : > { %p1156_p5 = scmp.ne.s32.totalorder %s1470_s10, %s1155_s22  ;;  %p1160_p9 = scmp.lt.s32.totalorder %s1470_s10, %s1558_s2 }
 0x136   : > { %p1161_p11 = scmp.lt.s32.totalorder %s1159_s21, %s1155_s22 }
 0x137   : > { %p1157_p7 = pnand %p1156_p5, %p1574_p4 }
 0x138   : > { %p1162_p10 = por %p1161_p11, %p1160_p9 }
 0x139   : > { %p1158_p6 = pneg %p1157_p7 }
 0x13b   : > { %p1163_p1 = pnand %p1162_p10, %p1158_p6 }
 0x13d   : > { %1166 = shalt.err (!%p1163_p1)
}
 0x13e   : > { %s1262_s8 = smov 128   ;;  %s1263_s26 = smov 8   ;;  %878 = vst [vmem:[%s1448_s24 + $0x18] sm:$0xff] %v854_v54   ;;  %882 = vst [vmem:[%s1448_s24 + $0x38] sm:$0xff] %v874_v55  }
 0x13f   : > { %1009 = dma.vmem_to_hbm [thread:$0]  (%p1574_p4), %s1472_s5, 2048, %s1470_s10, %s619_s4, %s1262_s8, %s1262_s8, %s1263_s26  }
 0x140   : > { %s624_s15 = scalar_lea.sflag [#allocation10], %s1407_s11  ;;  %s1167_s27 = scalar_lea.vmem %s1463_s30, 1024 }
 0x141   : > { %p1168_p8 = scmp.ne.s32.totalorder %s1463_s30, %s1167_s27  ;;  %s1264_s20 = smov [#allocation9]  }
 0x142   : > { %s1171_s22 = sshll.u32 %s1264_s20, 4  ;;  %s1172_s22 = int_to_ptr.vmem [resolvable:$false] %s1171_s22 }
 0x143   : > { %p1169_p12 = pnand %p1168_p8, %p1574_p4  ;;  %s1173_s29 = scalar_lea.vmem %s1172_s22, 2048 }
 0x144   : > { %p1174_p0 = scmp.lt.s32.totalorder %s1463_s30, %s1172_s22  ;;  %p1175_p2 = scmp.lt.s32.totalorder %s1173_s29, %s1167_s27 }
 0x145   : > { %p1170_p13 = pneg %p1169_p12 }
 0x146   : > { %p1176_p3 = por %p1175_p2, %p1174_p0 }
 0x148   : > { %p1177_p5 = pnand %p1176_p3, %p1170_p13 }
 0x14a   : > { %1180 = shalt.err (!%p1177_p5)
}
 0x14b   : > { %s1181_s24 = scalar_lea.hbm %s1484_s18, 1024  ;;  %s1185_s4 = scalar_lea.hbm %s1559_s3, 3072 }
 0x14c   : > { %p1182_p7 = scmp.ne.s32.totalorder %s1484_s18, %s1181_s24  ;;  %p1186_p11 = scmp.lt.s32.totalorder %s1484_s18, %s1559_s3 }
 0x14d   : > { %p1187_p10 = scmp.lt.s32.totalorder %s1185_s4, %s1181_s24 }
 0x14e   : > { %p1183_p6 = pnand %p1182_p7, %p1574_p4 }
 0x14f   : > { %p1188_p1 = por %p1187_p10, %p1186_p11 }
 0x150   : > { %p1184_p9 = pneg %p1183_p6 }
 0x152   : > { %p1189_p8 = pnand %p1188_p1, %p1184_p9 }
 0x154   : > { %1192 = shalt.err (!%p1189_p8)
}
 0x155   : > { %s1265_s7 = smov 64   ;;  %s1266_s25 = smov 4  }
 0x156   : > { %1010 = dma.vmem_to_hbm [thread:$0]  (%p1574_p4), %s1463_s30, 1024, %s1484_s18, %s624_s15, %s1265_s7, %s1265_s7, %s1266_s25  }
 0x157 PF: > { %p1031_p12 = scmp.ge.s32.totalorder %s1255_s17, 2  ;;  %s668_s8 = sand.u32 1, %s1235_s12  }
 0x158   : > { %p1575_p13 = scmp.ne.s32.totalorder %s1566_s23, 0  ;;  %s669_s26 = scalar_lea.sflag [#allocation5], %s668_s8 }
 0x15a   : > { %p1022_p0 = pnand %p1031_p12, %p1575_p13 }
 0x15c   : > { %p1023_p2 = pneg %p1022_p0 }
 0x15e   : > { %1226 = dma.done.wait (%p1023_p2), %s669_s26, 2048  }
 0x15f   : > { %1228 = vsyncadd (%p1023_p2), %s669_s26, 4294965248  ;;  %s678_s27 = scalar_lea.sflag [#allocation10], %s668_s8 }
 0x160   : > { %1230 = dma.done.wait (%p1023_p2), %s678_s27, 1024  }
 0x161   : > { %1232 = vsyncadd (%p1023_p2), %s678_s27, 4294966272  ;;  %s24_s17 = sadd.s32 1, %s1255_s17   ;;  %s1576_s12 = smov %s1239_s13 }
 0x162   : > { %p21_p3 = scmp.ge.s32.totalorder %s24_s17, 5   ;;  %s1577_s13 = smov %s1243_s14 }
 0x163   : > { %s1578_s14 = smov %s1385_s19  ;;  %s1579_s15 = smov %s1251_s16 }
 0x164   : > { %s1580_s16 = smov %s1582_s28  ;;  %23 = sbr.rel (!%p21_p3) target bundleno = 9 (0x9), region = 103 }
 0x169   :  { %683 = vsyncpa [#allocation4], 1 }
 0x16a   :  { %685 = vsyncpa [#allocation4 + $0x1], 1 }
 0x16b   :  { %686 = vsyncpa [#allocation7], 1 }
 0x16c   :  { %687 = vsyncpa [#allocation5], 1 }
 0x16d   :  { %689 = vsyncpa [#allocation5 + $0x1], 1 }
 0x16e   :  { %690 = vsyncpa [#allocation10], 1 }
 0x16f   :  { %692 = vsyncpa [#allocation10 + $0x1], 1 }

</bundles_post_ra>
